<compile_context>
chip_gen: v7x
topology: tpu7x:2x2x1
jax: 0.10.0
libtpu: 0.0.40
codegen_flags: <defaults>
</compile_context>

<pallas_src>
import jax
import jax.numpy as jnp
from jax.experimental import pallas as pl
from jax.experimental.pallas import tpu as pltpu


def _cdiv(a, b):
    return -(-a // b)


def _round_up(a, m):
    return _cdiv(a, m) * m


# ----------------------------------------------------------------------------
# Kernel: fused MLP forward for one batch tile (batch-major layout)
# ----------------------------------------------------------------------------
def _mlp_kernel(x_ref,
                w1t_ref, b1_ref,
                w2t_ref, b2_ref,
                w3t_ref, b3_ref,
                w4t_ref, b4_ref,
                w5t_ref, b5_ref,
                o_ref):
    x = x_ref[...]                                  # (bt, 3)  f32
    w1t = w1t_ref[...]                              # (3, 64)  f32
    w2t = w2t_ref[...]                              # (64,128) bf16
    cdt = w2t.dtype

    # ---- Layer 1: Linear(3, 64) + ReLU (VPU) --------------------------------
    # K=3 would waste an entire MXU streaming pass; three broadcast FMAs keep
    # the binding vex/MXU slot free.
    h = (x[:, 0:1] * w1t[0:1, :]
         + x[:, 1:2] * w1t[1:2, :]
         + x[:, 2:3] * w1t[2:3, :]
         + b1_ref[...])                             # (bt, 64) f32
    h = jnp.maximum(h, 0.0).astype(cdt)             # single fused cast -> bf16

    # ---- Layer 2: Linear(64, 128) + ReLU (MXU, bf16 in / f32 acc) -----------
    h = jnp.maximum(
        jnp.dot(h, w2t, preferred_element_type=jnp.float32) + b2_ref[...],
        0.0).astype(cdt)                            # (bt, 128) bf16

    # ---- Layer 3: Linear(128, 64) + ReLU (MXU) -------------------------------
    h = jnp.maximum(
        jnp.dot(h, w3t_ref[...], preferred_element_type=jnp.float32)
        + b3_ref[...], 0.0).astype(cdt)             # (bt, 64) bf16

    # ---- Layer 4: Linear(64, 32) + ReLU (MXU) --------------------------------
    h = jnp.maximum(
        jnp.dot(h, w4t_ref[...], preferred_element_type=jnp.float32)
        + b4_ref[...], 0.0).astype(cdt)             # (bt, 32) bf16

    # ---- Layer 5: Linear(32, 4), no activation (MXU) -------------------------
    out = jnp.dot(h, w5t_ref[...], preferred_element_type=jnp.float32) \
        + b5_ref[...]                               # (bt, 4) f32
    o_ref[...] = out.astype(o_ref.dtype)


# ----------------------------------------------------------------------------
# Wrapper
# ----------------------------------------------------------------------------
def deep_nn_forward(x, params, *, batch_tile=2048, compute_dtype=jnp.bfloat16):
    """Fused DeepNN forward. x: (N, 3) f32 -> (N, 4) f32.

    `params` uses the PyTorch nn.Linear layout: [(w, b), ...] with w = (out, in)
    and b = (out,). `batch_tile` is a request; it is rounded to a multiple of 8
    and shrunk so the grid has >= 2 steps (both v7x TensorCores).  Sweep
    2048-4096 for throughput.
    """
    n, d_in = x.shape
    assert d_in == 3
    d_out = params[-1][0].shape[0]

    # ---- tile / grid selection ----------------------------------------------
    bt = max(8, min(_round_up(batch_tile, 8), _round_up(n, 8)))
    if n > 8 and _cdiv(n, bt) < 2:
        # Keep >= 2 grid steps so dimension_semantics=("parallel",) can shard
        # across both TensorCores on v7x.
        bt = _round_up(_cdiv(n, 2), 8)
    n_pad = _round_up(n, bt)
    grid = (n_pad // bt,)

    # Row padding (contiguous copy, cheap) only when needed.
    x_in = x if n_pad == n else jnp.pad(x, ((0, n_pad - n), (0, 0)))

    # ---- parameter prep -------------------------------------------------------
    # Weights transposed to (in, out) so dots are (bt,K)@(K,N); layer-1 stays
    # f32 (VPU path), MXU layers get compute_dtype. Biases as (1, out) f32.
    flat_params = []
    in_specs = [pl.BlockSpec((bt, d_in), lambda i: (i, 0))]
    for li, (w, b) in enumerate(params):
        w_dtype = jnp.float32 if li == 0 else compute_dtype
        wt = w.T.astype(w_dtype)
        bb = b.reshape(1, -1).astype(jnp.float32)
        flat_params.append(wt)
        flat_params.append(bb)
        in_specs.append(pl.BlockSpec(wt.shape, lambda i: (0, 0)))
        in_specs.append(pl.BlockSpec(bb.shape, lambda i: (0, 0)))
    out_spec = pl.BlockSpec((bt, d_out), lambda i: (i, 0))

    # ---- VMEM budget -----------------------------------------------------------
    # x/out tiles are lane-padded to 128 in VMEM and double-buffered; activation
    # slabs counted once in f32 (pre-cast) and once in bf16, 2x headroom, then
    # clamped to 48 MiB so v7x (64 MiB physical VMEM per TC) keeps compiler
    # scratch headroom.
    lane = 128
    io_bytes = 2 * 2 * (bt * lane * 4)                  # x + out, double-buffered
    act_bytes = bt * (64 + 128 + 64 + 32) * (4 + 2)     # f32 epilogue + bf16 slabs
    weight_bytes = 64 * 1024
    vmem_limit = int(min(max(2 * (io_bytes + act_bytes) + weight_bytes + (2 << 20),
                             16 << 20),
                         48 << 20))

    out = pl.pallas_call(
        _mlp_kernel,
        out_shape=jax.ShapeDtypeStruct((n_pad, d_out), jnp.float32),
        grid_spec=pltpu.PrefetchScalarGridSpec(
            num_scalar_prefetch=0,
            grid=grid,
            in_specs=in_specs,
            out_specs=out_spec,
        ),
        compiler_params=pltpu.CompilerParams(
            dimension_semantics=("parallel",),
            vmem_limit_bytes=vmem_limit,
        ),
    )(x_in, *flat_params)

    # Contiguous row slice (free when n_pad == n).
    return out if n_pad == n else out[:n]


# ----------------------------------------------------------------------------
# Deterministic parameter init (mirrors nn.Linear's U(-1/sqrt(fan_in), +..));
# weights stored in PyTorch layout (out_features, in_features).
# ----------------------------------------------------------------------------
def init_params(key):
    dims = [3, 64, 128, 64, 32, 4]
    params = []
    for i in range(len(dims) - 1):
        fan_in, fan_out = dims[i], dims[i + 1]
        key, kw, kb = jax.random.split(key, 3)
        bound = 1.0 / float(fan_in) ** 0.5
        w = jax.random.uniform(kw, (fan_out, fan_in), jnp.float32, -bound, bound)
        b = jax.random.uniform(kb, (fan_out,), jnp.float32, -bound, bound)
        params.append((w, b))
    return params


# Pure-JAX reference mirroring the kernel numerics (f32 layer 1, bf16 MXU
# layers with f32 accumulation, f32 bias/ReLU epilogue).
def reference_forward(x, params, compute_dtype=jnp.bfloat16):
    w1, b1 = params[0]
    h = jnp.maximum(x @ w1.T + b1, 0.0)
    last = len(params) - 1
    for li, (w, b) in enumerate(params[1:], start=1):
        h = jnp.dot(h.astype(compute_dtype), w.astype(compute_dtype).T,
                    preferred_element_type=jnp.float32) + b
        if li < last:
            h = jnp.maximum(h, 0.0)
    return h


if __name__ == "__main__":
    key = jax.random.PRNGKey(0)
    key, kx = jax.random.split(key)

    n = 300  # small, deliberately NOT a multiple of the batch tile
    x = jax.random.normal(kx, (n, 3), jnp.float32)
    params = init_params(key)

    out = deep_nn_forward(x, params)          # default batch_tile=2048,
    out = jax.block_until_ready(out)          # auto-shrunk to a 2-step grid

    ref = reference_forward(x, params)
    assert out.shape == (n, 4), out.shape
    assert jnp.allclose(out, ref, atol=1e-2, rtol=1e-2), (
        "mismatch vs reference, max abs diff = "
        f"{float(jnp.max(jnp.abs(out - ref)))}")

    print("KERNEL_OK")
</pallas_src>

<mosaic_0001>
module attributes {stable_mosaic.version = 11 : i64} {
  func.func @_mlp_kernel(%arg0: i32, %arg1: memref<152x3xf32, #tpu.memory_space<vmem>>, %arg2: memref<3x64xf32, #tpu.memory_space<vmem>>, %arg3: memref<1x64xf32, #tpu.memory_space<vmem>>, %arg4: memref<64x128xbf16, #tpu.memory_space<vmem>>, %arg5: memref<1x128xf32, #tpu.memory_space<vmem>>, %arg6: memref<128x64xbf16, #tpu.memory_space<vmem>>, %arg7: memref<1x64xf32, #tpu.memory_space<vmem>>, %arg8: memref<64x32xbf16, #tpu.memory_space<vmem>>, %arg9: memref<1x32xf32, #tpu.memory_space<vmem>>, %arg10: memref<32x4xbf16, #tpu.memory_space<vmem>>, %arg11: memref<1x4xf32, #tpu.memory_space<vmem>>, %arg12: memref<152x4xf32, #tpu.memory_space<vmem>>) attributes {dimension_semantics = [#tpu.dimension_semantics<parallel>], iteration_bounds = array<i64: 2>, scalar_prefetch = 0 : i64, scratch_operands = 0 : i64, tpu.core_type = #tpu.core_type<tc>, window_params = [{transform_indices = @transform_0, window_bounds = array<i64: 152, 3>}, {pipeline_mode = #tpu.pipeline_mode<synchronous>, transform_indices = @transform_1, window_bounds = array<i64: 3, 64>}, {pipeline_mode = #tpu.pipeline_mode<synchronous>, transform_indices = @transform_2, window_bounds = array<i64: 1, 64>}, {pipeline_mode = #tpu.pipeline_mode<synchronous>, transform_indices = @transform_3, window_bounds = array<i64: 64, 128>}, {pipeline_mode = #tpu.pipeline_mode<synchronous>, transform_indices = @transform_4, window_bounds = array<i64: 1, 128>}, {pipeline_mode = #tpu.pipeline_mode<synchronous>, transform_indices = @transform_5, window_bounds = array<i64: 128, 64>}, {pipeline_mode = #tpu.pipeline_mode<synchronous>, transform_indices = @transform_6, window_bounds = array<i64: 1, 64>}, {pipeline_mode = #tpu.pipeline_mode<synchronous>, transform_indices = @transform_7, window_bounds = array<i64: 64, 32>}, {pipeline_mode = #tpu.pipeline_mode<synchronous>, transform_indices = @transform_8, window_bounds = array<i64: 1, 32>}, {pipeline_mode = #tpu.pipeline_mode<synchronous>, transform_indices = @transform_9, window_bounds = array<i64: 32, 4>}, {pipeline_mode = #tpu.pipeline_mode<synchronous>, transform_indices = @transform_10, window_bounds = array<i64: 1, 4>}, {transform_indices = @transform_11, window_bounds = array<i64: 152, 4>}]} {
    %c0 = arith.constant 0 : index
    %c0_0 = arith.constant 0 : index
    %0 = vector.load %arg1[%c0, %c0_0] : memref<152x3xf32, #tpu.memory_space<vmem>>, vector<152x3xf32>
    %c0_1 = arith.constant 0 : index
    %c0_2 = arith.constant 0 : index
    %1 = vector.load %arg2[%c0_1, %c0_2] : memref<3x64xf32, #tpu.memory_space<vmem>>, vector<3x64xf32>
    %c0_3 = arith.constant 0 : index
    %c0_4 = arith.constant 0 : index
    %2 = vector.load %arg4[%c0_3, %c0_4] : memref<64x128xbf16, #tpu.memory_space<vmem>>, vector<64x128xbf16>
    %3 = vector.extract_strided_slice %0 {offsets = [0, 0], sizes = [152, 1], strides = [1, 1]} : vector<152x3xf32> to vector<152x1xf32>
    %4 = vector.extract_strided_slice %1 {offsets = [0, 0], sizes = [1, 64], strides = [1, 1]} : vector<3x64xf32> to vector<1x64xf32>
    %5 = vector.broadcast %3 : vector<152x1xf32> to vector<152x64xf32>
    %6 = vector.broadcast %4 : vector<1x64xf32> to vector<152x64xf32>
    %7 = arith.mulf %5, %6 : vector<152x64xf32>
    %8 = vector.extract_strided_slice %0 {offsets = [0, 1], sizes = [152, 1], strides = [1, 1]} : vector<152x3xf32> to vector<152x1xf32>
    %9 = vector.extract_strided_slice %1 {offsets = [1, 0], sizes = [1, 64], strides = [1, 1]} : vector<3x64xf32> to vector<1x64xf32>
    %10 = vector.broadcast %8 : vector<152x1xf32> to vector<152x64xf32>
    %11 = vector.broadcast %9 : vector<1x64xf32> to vector<152x64xf32>
    %12 = arith.mulf %10, %11 : vector<152x64xf32>
    %13 = arith.addf %7, %12 : vector<152x64xf32>
    %14 = vector.extract_strided_slice %0 {offsets = [0, 2], sizes = [152, 1], strides = [1, 1]} : vector<152x3xf32> to vector<152x1xf32>
    %15 = vector.extract_strided_slice %1 {offsets = [2, 0], sizes = [1, 64], strides = [1, 1]} : vector<3x64xf32> to vector<1x64xf32>
    %16 = vector.broadcast %14 : vector<152x1xf32> to vector<152x64xf32>
    %17 = vector.broadcast %15 : vector<1x64xf32> to vector<152x64xf32>
    %18 = arith.mulf %16, %17 : vector<152x64xf32>
    %19 = arith.addf %13, %18 : vector<152x64xf32>
    %c0_5 = arith.constant 0 : index
    %c0_6 = arith.constant 0 : index
    %20 = vector.load %arg3[%c0_5, %c0_6] : memref<1x64xf32, #tpu.memory_space<vmem>>, vector<1x64xf32>
    %21 = vector.broadcast %20 : vector<1x64xf32> to vector<152x64xf32>
    %22 = arith.addf %19, %21 : vector<152x64xf32>
    %cst = arith.constant 0.000000e+00 : f32
    %23 = vector.broadcast %cst : f32 to vector<152x64xf32>
    %24 = arith.maximumf %22, %23 : vector<152x64xf32>
    %25 = arith.truncf %24 : vector<152x64xf32> to vector<152x64xbf16>
    %cst_7 = arith.constant dense<0.000000e+00> : vector<152x128xf32>
    %26 = tpu.matmul %25, %2, %cst_7 {dimension_numbers = #tpu.dot_dimension_numbers<[1], [0], [0], [1], [0, 0, 1, 1], [], []>} : vector<152x64xbf16>, vector<64x128xbf16>, vector<152x128xf32> -> vector<152x128xf32>
    %c0_8 = arith.constant 0 : index
    %c0_9 = arith.constant 0 : index
    %27 = vector.load %arg5[%c0_8, %c0_9] : memref<1x128xf32, #tpu.memory_space<vmem>>, vector<1x128xf32>
    %28 = vector.broadcast %27 : vector<1x128xf32> to vector<152x128xf32>
    %29 = arith.addf %26, %28 : vector<152x128xf32>
    %cst_10 = arith.constant 0.000000e+00 : f32
    %30 = vector.broadcast %cst_10 : f32 to vector<152x128xf32>
    %31 = arith.maximumf %29, %30 : vector<152x128xf32>
    %32 = arith.truncf %31 : vector<152x128xf32> to vector<152x128xbf16>
    %c0_11 = arith.constant 0 : index
    %c0_12 = arith.constant 0 : index
    %33 = vector.load %arg6[%c0_11, %c0_12] : memref<128x64xbf16, #tpu.memory_space<vmem>>, vector<128x64xbf16>
    %cst_13 = arith.constant dense<0.000000e+00> : vector<152x64xf32>
    %34 = tpu.matmul %32, %33, %cst_13 {dimension_numbers = #tpu.dot_dimension_numbers<[1], [0], [0], [1], [0, 0, 1, 1], [], []>} : vector<152x128xbf16>, vector<128x64xbf16>, vector<152x64xf32> -> vector<152x64xf32>
    %c0_14 = arith.constant 0 : index
    %c0_15 = arith.constant 0 : index
    %35 = vector.load %arg7[%c0_14, %c0_15] : memref<1x64xf32, #tpu.memory_space<vmem>>, vector<1x64xf32>
    %36 = vector.broadcast %35 : vector<1x64xf32> to vector<152x64xf32>
    %37 = arith.addf %34, %36 : vector<152x64xf32>
    %cst_16 = arith.constant 0.000000e+00 : f32
    %38 = vector.broadcast %cst_16 : f32 to vector<152x64xf32>
    %39 = arith.maximumf %37, %38 : vector<152x64xf32>
    %40 = arith.truncf %39 : vector<152x64xf32> to vector<152x64xbf16>
    %c0_17 = arith.constant 0 : index
    %c0_18 = arith.constant 0 : index
    %41 = vector.load %arg8[%c0_17, %c0_18] : memref<64x32xbf16, #tpu.memory_space<vmem>>, vector<64x32xbf16>
    %cst_19 = arith.constant dense<0.000000e+00> : vector<152x32xf32>
    %42 = tpu.matmul %40, %41, %cst_19 {dimension_numbers = #tpu.dot_dimension_numbers<[1], [0], [0], [1], [0, 0, 1, 1], [], []>} : vector<152x64xbf16>, vector<64x32xbf16>, vector<152x32xf32> -> vector<152x32xf32>
    %c0_20 = arith.constant 0 : index
    %c0_21 = arith.constant 0 : index
    %43 = vector.load %arg9[%c0_20, %c0_21] : memref<1x32xf32, #tpu.memory_space<vmem>>, vector<1x32xf32>
    %44 = vector.broadcast %43 : vector<1x32xf32> to vector<152x32xf32>
    %45 = arith.addf %42, %44 : vector<152x32xf32>
    %cst_22 = arith.constant 0.000000e+00 : f32
    %46 = vector.broadcast %cst_22 : f32 to vector<152x32xf32>
    %47 = arith.maximumf %45, %46 : vector<152x32xf32>
    %48 = arith.truncf %47 : vector<152x32xf32> to vector<152x32xbf16>
    %c0_23 = arith.constant 0 : index
    %c0_24 = arith.constant 0 : index
    %49 = vector.load %arg10[%c0_23, %c0_24] : memref<32x4xbf16, #tpu.memory_space<vmem>>, vector<32x4xbf16>
    %cst_25 = arith.constant dense<0.000000e+00> : vector<152x4xf32>
    %50 = tpu.matmul %48, %49, %cst_25 {dimension_numbers = #tpu.dot_dimension_numbers<[1], [0], [0], [1], [0, 0, 1, 1], [], []>} : vector<152x32xbf16>, vector<32x4xbf16>, vector<152x4xf32> -> vector<152x4xf32>
    %c0_26 = arith.constant 0 : index
    %c0_27 = arith.constant 0 : index
    %51 = vector.load %arg11[%c0_26, %c0_27] : memref<1x4xf32, #tpu.memory_space<vmem>>, vector<1x4xf32>
    %52 = vector.broadcast %51 : vector<1x4xf32> to vector<152x4xf32>
    %53 = arith.addf %50, %52 : vector<152x4xf32>
    %c0_28 = arith.constant 0 : index
    %c0_29 = arith.constant 0 : index
    %54 = vector.load %arg12[%c0_28, %c0_29] : memref<152x4xf32, #tpu.memory_space<vmem>>, vector<152x4xf32>
    tpu.vector_store %arg12[%c0_28, %c0_29], %53 {strides = array<i32>} : memref<152x4xf32, #tpu.memory_space<vmem>>, vector<152x4xf32>,
    return
  }
  func.func @transform_0(%arg0: i32) -> (i32, i32) {
    %c0_i32 = arith.constant 0 : i32
    %c0_i32_0 = arith.constant 0 : i32
    return %arg0, %c0_i32 : i32, i32
  }
  func.func @transform_1(%arg0: i32) -> (i32, i32) {
    %c0_i32 = arith.constant 0 : i32
    %c0_i32_0 = arith.constant 0 : i32
    %c0_i32_1 = arith.constant 0 : i32
    return %c0_i32, %c0_i32_0 : i32, i32
  }
  func.func @transform_2(%arg0: i32) -> (i32, i32) {
    %c0_i32 = arith.constant 0 : i32
    %c0_i32_0 = arith.constant 0 : i32
    %c0_i32_1 = arith.constant 0 : i32
    return %c0_i32, %c0_i32_0 : i32, i32
  }
  func.func @transform_3(%arg0: i32) -> (i32, i32) {
    %c0_i32 = arith.constant 0 : i32
    %c0_i32_0 = arith.constant 0 : i32
    %c0_i32_1 = arith.constant 0 : i32
    return %c0_i32, %c0_i32_0 : i32, i32
  }
  func.func @transform_4(%arg0: i32) -> (i32, i32) {
    %c0_i32 = arith.constant 0 : i32
    %c0_i32_0 = arith.constant 0 : i32
    %c0_i32_1 = arith.constant 0 : i32
    return %c0_i32, %c0_i32_0 : i32, i32
  }
  func.func @transform_5(%arg0: i32) -> (i32, i32) {
    %c0_i32 = arith.constant 0 : i32
    %c0_i32_0 = arith.constant 0 : i32
    %c0_i32_1 = arith.constant 0 : i32
    return %c0_i32, %c0_i32_0 : i32, i32
  }
  func.func @transform_6(%arg0: i32) -> (i32, i32) {
    %c0_i32 = arith.constant 0 : i32
    %c0_i32_0 = arith.constant 0 : i32
    %c0_i32_1 = arith.constant 0 : i32
    return %c0_i32, %c0_i32_0 : i32, i32
  }
  func.func @transform_7(%arg0: i32) -> (i32, i32) {
    %c0_i32 = arith.constant 0 : i32
    %c0_i32_0 = arith.constant 0 : i32
    %c0_i32_1 = arith.constant 0 : i32
    return %c0_i32, %c0_i32_0 : i32, i32
  }
  func.func @transform_8(%arg0: i32) -> (i32, i32) {
    %c0_i32 = arith.constant 0 : i32
    %c0_i32_0 = arith.constant 0 : i32
    %c0_i32_1 = arith.constant 0 : i32
    return %c0_i32, %c0_i32_0 : i32, i32
  }
  func.func @transform_9(%arg0: i32) -> (i32, i32) {
    %c0_i32 = arith.constant 0 : i32
    %c0_i32_0 = arith.constant 0 : i32
    %c0_i32_1 = arith.constant 0 : i32
    return %c0_i32, %c0_i32_0 : i32, i32
  }
  func.func @transform_10(%arg0: i32) -> (i32, i32) {
    %c0_i32 = arith.constant 0 : i32
    %c0_i32_0 = arith.constant 0 : i32
    %c0_i32_1 = arith.constant 0 : i32
    return %c0_i32, %c0_i32_0 : i32, i32
  }
  func.func @transform_11(%arg0: i32) -> (i32, i32) {
    %c0_i32 = arith.constant 0 : i32
    %c0_i32_0 = arith.constant 0 : i32
    return %arg0, %c0_i32 : i32, i32
  }
}

</mosaic_0001>

<bundles_post_ra>
// kernel: tpu_custom_call.1
= control target key start
LH: loop header
LB: loop body
LE: loop exit
PB: predicated region body
PF: predicated region fallthrough
CT: control target
= control target key end

     0   :  { %s2062_s17 = smov 0   ;;  %s2459_s0 = inlined_call_operand.vmem [shape: f32[304,3], index: 0, kind: input, shape index: {}]   ;;  %s2460_s1 = inlined_call_operand.vmem [shape: f32[3,64], index: 1, kind: input, shape index: {}]   ;;  %s2461_s2 = inlined_call_operand.vmem [shape: f32[1,64], index: 2, kind: input, shape index: {}]   ;;  %s2462_s3 = inlined_call_operand.vmem [shape: bf16[64,128], index: 3, kind: input, shape index: {}]   ;;  %s2463_s4 = inlined_call_operand.vmem [shape: f32[1,128], index: 4, kind: input, shape index: {}]   ;;  %s2464_s5 = inlined_call_operand.vmem [shape: bf16[128,64], index: 5, kind: input, shape index: {}]   ;;  %s2465_s6 = inlined_call_operand.vmem [shape: f32[1,64], index: 6, kind: input, shape index: {}]   ;;  %s2466_s7 = inlined_call_operand.vmem [shape: bf16[64,32], index: 7, kind: input, shape index: {}]   ;;  %s2467_s8 = inlined_call_operand.vmem [shape: f32[1,32], index: 8, kind: input, shape index: {}]   ;;  %s2468_s9 = inlined_call_operand.vmem [shape: bf16[32,4], index: 9, kind: input, shape index: {}]   ;;  %s2469_s10 = inlined_call_operand.vmem [shape: f32[1,4], index: 10, kind: input, shape index: {}]   ;;  %s2470_s11 = inlined_call_operand.vmem [shape: f32[304,4], index: 11, kind: output, shape index: {}]  }
   0x1 LB: > { %s1695_s18 = sadd.s32 4294967295, %s1997_s17   ;;  %p1699_p0 = scmp.ge.s32.totalorder %s1997_s17, 1  ;;  %s1997_s17 = sphi %s2062_s17, %s21_s17  }
   0x2   : > { %p338_p1 = scmp.lt.s32.totalorder %s1997_s17, 3 }
   0x4   : > { %p339_p2 = pnand %p1699_p0, %p338_p1 }
   0x5   : > { %s378_s19 = smul.u32 (!%p339_p2), 19, %s1695_s18  ;;  %v1999_v0 = vmov (!%p339_p2), 1   ;;  %v2000_v1 = vmov (!%p339_p2), 0   ;;  %v2001_v7 = vmov (!%p339_p2), 2   ;;  %v1973_v12 = vld [vmem:[%s2462_s3] sm:$0xff] (!%p339_p2)   ;;  %v1974_v14 = vld [vmem:[%s2462_s3 + $0x8] sm:$0xff] (!%p339_p2)   ;;  %v514_v34 = vlaneseq (!%p339_p2) }
   0x6   : > { %342 = sbr.rel (%p339_p2) target bundleno = 1196 (0x4ac), region = 64  ;;  %1947 = vset.pattern.permute.xlu1 (!%p339_p2), %v1999_v0  ;;  %1946 = vset.pattern.permute.xlu0 (!%p339_p2), %v2000_v1  ;;  %v1975_v15 = vld [vmem:[%s2462_s3 + $0x10] sm:$0xff] (!%p339_p2)   ;;  %v1976_v17 = vld [vmem:[%s2462_s3 + $0x18] sm:$0xff] (!%p339_p2)   ;;  %v410_v42 = vld [vmem:[%s2460_s1] sm:$0x7] (!%p339_p2)  ;;  %vm859_vm0 = vcmask (!%p339_p2), 523264  }
   0x7   : > { %p379_p3 = scmp.lt.s32.totalorder (!%p339_p2), %s378_s19, 37  ;;  %1815 = vmatprep.subr.bf16.mxu0 (!%p339_p2), %v1973_v12  ;;  %v515_v36 = vshrl.u32 (!%p339_p2), %v514_v34, 7  ;;  %v1982_v34 = vld [vmem:[%s2464_s5 + $0x28] sm:$0xff] (!%p339_p2)   ;;  %vm1476_vm1 = vcmask (!%p339_p2), 261120   ;;  %vm1619_vm2 = vcmask (!%p339_p2), 31744  }
   0x8   : > { %1816 = vmatpush3.bf16.msra.mxu0 (!%p339_p2), %v1973_v12  ;;  %v1978_v12 = vld [vmem:[%s2464_s5 + $0x8] sm:$0xff] (!%p339_p2)  }
   0x9   : > { %1817 = vmatprep.subr.bf16.mxu0 (!%p339_p2), %v1974_v14  ;;  %v615_v39 = vsub.s32 (!%p339_p2), 1, %v515_v36  ;;  %v516_v40 = vsub.s32 (!%p339_p2), 0, %v515_v36  ;;  %v733_v43 = vsub.s32 (!%p339_p2), 2, %v515_v36 }
   0xb   : > { %v2162_v45 = vrot.slane (!%p339_p2), %v410_v42, %v615_v39  ;;  %v2164_v46 = vrot.slane (!%p339_p2), %v410_v42, %v516_v40  ;;  %v2166_v48 = vrot.slane (!%p339_p2), %v410_v42, %v733_v43 }
   0xc   : > { %1818 = vmatpush3.bf16.msra.mxu0 (!%p339_p2), %v1974_v14 }
   0xd   : > { %s2472_s19 = smov (!%p379_p3, %s378_s19), 37  ;;  %1819 = vmatprep.subr.bf16.mxu0 %v1975_v15 }
   0xe   : > { %s1700_s20 = sshll.u32 %s2472_s19, 3 }
   0xf   : > { %s2080_s23 = scalar_lea.vmem %s2459_s0, %s1700_s20  ;;  %s2416_s26 = scalar_lea.vmem %s2470_s11, %s1700_s20 }
  0x10   : > { %v391_v2 = vld [vmem:[%s2080_s23] sm:$0xff]  ;;  %v392_v3 = vld [vmem:[%s2080_s23 + $0x8] sm:$0xff]  ;;  %v393_v4 = vld [vmem:[%s2080_s23 + $0x10] sm:$0xff]  ;;  %1820 = vmatpush3.bf16.msra.mxu0 %v1975_v15 }
  0x11   : > { %538 = vperm.xlu1 %1947, %v391_v2   ;;  %421 = vperm.xlu0 %1946, %v391_v2   ;;  %v394_v5 = vld [vmem:[%s2080_s23 + $0x18] sm:$0xff]  ;;  %v396_v6 = vld [vmem:[%s2080_s23 + $0x28] sm:$0xff]  ;;  %v397_v8 = vld [vmem:[%s2080_s23 + $0x30] sm:$0xff] }
  0x12   : > { %v2093_v9 = vld [vmem:[%s2080_s23 + $0x50] sm:$0xff]  ;;  %v2097_v10 = vld [vmem:[%s2080_s23 + $0x68] sm:$0xff]  ;;  %v395_v13 = vld [vmem:[%s2080_s23 + $0x20] sm:$0xff]  ;;  %1821 = vmatprep.subr.bf16.mxu0 %v1976_v17 }
  0x13   : > { %v2101_v11 = vld [vmem:[%s2080_s23 + $0x70] sm:$0xff]  ;;  %v398_v16 = vld [vmem:[%s2080_s23 + $0x38] sm:$0xff]  ;;  %v400_v18 = vld [vmem:[%s2080_s23 + $0x48] sm:$0xff] }
  0x14   : > { %1822 = vmatpush3.bf16.msra.mxu0 %v1976_v17  ;;  %v403_v19 = vld [vmem:[%s2080_s23 + $0x60] sm:$0xff]  ;;  %v406_v20 = vld [vmem:[%s2080_s23 + $0x78] sm:$0xff]  ;;  %v408_v23 = vld [vmem:[%s2080_s23 + $0x88] sm:$0xff] }
  0x15   : > { %542 = vperm.xlu1 %1947, %v392_v3   ;;  %426 = vperm.xlu0 %1946, %v392_v3   ;;  %v399_v21 = vld [vmem:[%s2080_s23 + $0x40] sm:$0xff]  ;;  %v402_v22 = vld [vmem:[%s2080_s23 + $0x58] sm:$0xff]  ;;  %v409_v24 = vld [vmem:[%s2080_s23 + $0x90] sm:$0xff] }
  0x16   : > { %v407_v25 = vld [vmem:[%s2080_s23 + $0x80] sm:$0xff] }
  0x19   : > { %1948 = vset.pattern.permute.xlu1 %v2000_v1  ;;  %431 = vperm.xlu0 %1946, %v393_v4  }
  0x1a   : > { %436 = vperm.xlu1 %1948, %v394_v5  }
  0x1d   : > { %1949 = vset.pattern.permute.xlu0 %v1999_v0 }
  0x1e   : > { %1950 = vset.pattern.permute.xlu1 %v1999_v0  ;;  %546 = vperm.xlu0 %1949, %v393_v4  }
  0x1f   : > { %550 = vperm.xlu1 %1950, %v394_v5  }
  0x22   : > { %558 = vperm.xlu0 %1949, %v396_v6  }
  0x23   : > { %1951 = vset.pattern.permute.xlu1 %v2001_v7 }
  0x24   : > { %656 = vperm.xlu1 %1951, %v391_v2  }
  0x26   : > { %562 = vperm.xlu0 %1949, %v397_v8  }
  0x28   : > { %664 = vperm.xlu1 %1951, %v393_v4  }
  0x2a   : > { %578 = vperm.xlu0 %1949, %v2093_v9  }
  0x2c   : > { %668 = vperm.xlu1 %1951, %v394_v5   ;;  %v2186_v5 = vld [vmem:[%s2461_s2] ss:$0 sm:$0xff] }
  0x2e   : > { %590 = vperm.xlu0 %1949, %v2097_v10  }
  0x30   : > { %1952 = vset.pattern.permute.xlu1 %v2000_v1 }
  0x31   : > { %446 = vperm.xlu1 %1952, %v396_v6  }
  0x32   : > { %594 = vperm.xlu0 %1949, %v2101_v11  }
  0x35   : > { %1953 = vset.pattern.permute.xlu1 %v1999_v0 }
  0x36   : > { %554 = vperm.xlu1 %1953, %v395_v13   ;;  %1965 = vset.pattern.permute.xlu0 %v2001_v7 }
  0x37   : > { %660 = vperm.xlu0 %1965, %v392_v3  }
  0x3a   : > { %1954 = vset.pattern.permute.xlu1 %v2000_v1 }
  0x3b   : > { %451 = vperm.xlu1 %1954, %v397_v8   ;;  %672 = vperm.xlu0 %1965, %v395_v13  }
  0x3f   : > { %456 = vperm.xlu1 %1954, %v398_v16   ;;  %684 = vperm.xlu0 %1965, %v398_v16  }
  0x43   : > { %1955 = vset.pattern.permute.xlu1 %v1999_v0  ;;  %692 = vperm.xlu0 %1965, %v400_v18  }
  0x44   : > { %566 = vperm.xlu1 %1955, %v398_v16  }
  0x47   : > { %704 = vperm.xlu0 %1965, %v403_v19  }
  0x48   : > { %1956 = vset.pattern.permute.xlu1 %v2001_v7 }
  0x49   : > { %676 = vperm.xlu1 %1956, %v396_v6  }
  0x4b   : > { %716 = vperm.xlu0 %1965, %v406_v20  }
  0x4d   : > { %680 = vperm.xlu1 %1956, %v397_v8  }
  0x4f   : > { %1968 = vset.pattern.permute.xlu0 %v2000_v1 }
  0x50   : > { %441 = vperm.xlu0 %1968, %v395_v13  }
  0x51   : > { %1957 = vset.pattern.permute.xlu1 %v2000_v1 }
  0x52   : > { %461 = vperm.xlu1 %1957, %v399_v21  }
  0x54   : > { %466 = vperm.xlu0 %1968, %v400_v18  }
  0x56   : > { %1958 = vset.pattern.permute.xlu1 %v1999_v0 }
  0x57   : > { %570 = vperm.xlu1 %1958, %v399_v21  }
  0x58   : > { %471 = vperm.xlu0 %1968, %v2093_v9  }
  0x5b   : > { %574 = vperm.xlu1 %1958, %v400_v18  }
  0x5c   : > { %481 = vperm.xlu0 %1968, %v403_v19  }
  0x5f   : > { %1959 = vset.pattern.permute.xlu1 %v2000_v1 }
  0x60   : > { %476 = vperm.xlu1 %1959, %v402_v22   ;;  %506 = vperm.xlu0 %1968, %v408_v23  }
  0x64   : > { %1960 = vset.pattern.permute.xlu1 %v1999_v0  ;;  %511 = vperm.xlu0 %1968, %v409_v24  }
  0x65   : > { %582 = vperm.xlu1 %1960, %v402_v22  }
  0x68   : > { %1971 = vset.pattern.permute.xlu0 %v2001_v7 }
  0x69   : > { %1961 = vset.pattern.permute.xlu1 %v2001_v7  ;;  %720 = vperm.xlu0 %1971, %v407_v25  }
  0x6a   : > { %688 = vperm.xlu1 %1961, %v399_v21  }
  0x6e   : > { %696 = vperm.xlu1 %1961, %v2093_v9  }
  0x72   : > { %700 = vperm.xlu1 %1961, %v402_v22  }
  0x76   : > { %1962 = vset.pattern.permute.xlu1 %v2000_v1 }
  0x77   : > { %486 = vperm.xlu1 %1962, %v2097_v10  }
  0x7b   : > { %1963 = vset.pattern.permute.xlu1 %v1999_v0 }
  0x7c   : > { %586 = vperm.xlu1 %1963, %v403_v19  }
  0x80   : > { %1964 = vset.pattern.permute.xlu1 %v2000_v1 }
  0x81   : > { %491 = vperm.xlu1 %1964, %v2101_v11  }
  0x85   : > { %496 = vperm.xlu1 %1964, %v406_v20  }
  0x89   : > { %1966 = vset.pattern.permute.xlu1 %v1999_v0 }
  0x8a   : > { %598 = vperm.xlu1 %1966, %v406_v20   ;;  %v1979_v20 = vld [vmem:[%s2464_s5 + $0x10] sm:$0xff]  }
  0x8e   : > { %1967 = vset.pattern.permute.xlu1 %v2001_v7 }
  0x8f   : > { %708 = vperm.xlu1 %1967, %v2097_v10  }
  0x90   : > { %v539_v26 = vpop.permute.xlu1 %538  ;;  %v422_v27 = vpop.permute.xlu0 %421 }
  0x91   : > { %v617_v53 = vmul.f32 %v2162_v45, %v539_v26  ;;  %v518_v54 = vmul.f32 %v2164_v46, %v422_v27 }
  0x93   : > { %712 = vperm.xlu1 %1967, %v2101_v11   ;;  %v636_v63 = vadd.f32 %v617_v53, %v518_v54  ;;  %v1977_v11 = vld [vmem:[%s2464_s5] sm:$0xff]  }
  0x94   : > { %v543_v28 = vpop.permute.xlu1 %542  ;;  %v427_v29 = vpop.permute.xlu0 %426  ;;  %1843 = vmatprep.subr.bf16.mxu1 %v1977_v11 }
  0x95   : > { %1844 = vmatpush3.bf16.msra.mxu1 %v1977_v11 }
  0x96   : > { %1845 = vmatprep.subr.bf16.mxu1 %v1978_v12 }
  0x97   : > { %1969 = vset.pattern.permute.xlu1 %v2000_v1  ;;  %v519_v1 = vmul.f32 %v2164_v46, %v427_v29 }
  0x98   : > { %501 = vperm.xlu1 %1969, %v407_v25   ;;  %v432_v30 = vpop.permute.xlu0 %431 }
  0x99   : > { %v437_v31 = vpop.permute.xlu1 %436  ;;  %v520_v50 = vmul.f32 %v2164_v46, %v432_v30  ;;  %1846 = vmatpush3.bf16.msra.mxu1 %v1978_v12 }
  0x9a   : > { %v521_v55 = vmul.f32 %v2164_v46, %v437_v31  ;;  %1847 = vmatprep.subr.bf16.mxu1 %v1979_v20  ;;  %v1981_v31 = vld [vmem:[%s2464_s5 + $0x20] sm:$0xff]  }
  0x9c   : > { %1970 = vset.pattern.permute.xlu1 %v1999_v0  ;;  %v618_v0 = vmul.f32 %v2162_v45, %v543_v28  ;;  %v1980_v28 = vld [vmem:[%s2464_s5 + $0x18] sm:$0xff]  }
  0x9d   : > { %602 = vperm.xlu1 %1970, %v407_v25   ;;  %v547_v32 = vpop.permute.xlu0 %546  ;;  %1848 = vmatpush3.bf16.msra.mxu1 %v1979_v20 }
  0x9e   : > { %v551_v33 = vpop.permute.xlu1 %550  ;;  %v619_v52 = vmul.f32 %v2162_v45, %v547_v32  ;;  %v637_v8 = vadd.f32 %v618_v0, %v519_v1  ;;  %1849 = vmatprep.subr.bf16.mxu1 %v1980_v28 }
  0x9f   : > { %v620_v51 = vmul.f32 %v2162_v45, %v551_v33 }
  0xa0   : > { %v638_v61 = vadd.f32 %v619_v52, %v520_v50 }
  0xa1   : > { %606 = vperm.xlu1 %1970, %v408_v23   ;;  %v2152_v35 = vpop.permute.xlu0 %558  ;;  %v639_v60 = vadd.f32 %v620_v51, %v521_v55  ;;  %1850 = vmatpush3.bf16.msra.mxu1 %v1980_v28 }
  0xa2   : > { %1851 = vmatprep.subr.bf16.mxu1 %v1981_v31  ;;  %v622_v40 = vmul.f32 %v2162_v45, %v2152_v35 }
  0xa3   : > { %v657_v37 = vpop.permute.xlu1 %656 }
  0xa4   : > { %v735_v58 = vmul.f32 %v2166_v48, %v657_v37 }
  0xa5   : > { %610 = vperm.xlu1 %1970, %v409_v24   ;;  %v2154_v38 = vpop.permute.xlu0 %562  ;;  %1852 = vmatpush3.bf16.msra.mxu1 %v1981_v31 }
  0xa6   : > { %v754_v3 = vadd.f32 %v735_v58, %v636_v63  ;;  %v623_v36 = vmul.f32 %v2162_v45, %v2154_v38  ;;  %1853 = vmatprep.subr.bf16.mxu1 %v1982_v34 }
  0xa7   : > { %v665_v41 = vpop.permute.xlu1 %664 }
  0xa8   : > { %v737_v62 = vmul.f32 %v2166_v48, %v665_v41  ;;  %v780_v14 = vadd.f32 %v2186_v5, %v754_v3 }
  0xa9   : > { %1972 = vset.pattern.permute.xlu1 %v2001_v7  ;;  %v2160_v44 = vpop.permute.xlu0 %578  ;;  %1854 = vmatpush3.bf16.msra.mxu1 %v1982_v34 }
  0xaa   : > { %724 = vperm.xlu1 %1972, %v408_v23   ;;  %v756_v6 = vadd.f32 %v737_v62, %v638_v61  ;;  %v799_v21 = vmax.f32 %v780_v14, 0.0 }
  0xab   : > { %v669_v47 = vpop.permute.xlu1 %668 }
  0xac   : > { %v738_v56 = vmul.f32 %v2166_v48, %v669_v47  ;;  %v782_v15 = vadd.f32 %v2186_v5, %v756_v6 }
  0xad   : > { %v2168_v49 = vpop.permute.xlu0 %590 }
  0xae   : > { %728 = vperm.xlu1 %1972, %v409_v24   ;;  %v757_v2 = vadd.f32 %v738_v56, %v639_v60  ;;  %v801_v23 = vmax.f32 %v782_v15, 0.0 }
  0xb0   : > { %v447_v57 = vpop.permute.xlu1 %446  ;;  %v783_v10 = vadd.f32 %v2186_v5, %v757_v2 }
  0xb1   : > { %v2178_v59 = vpop.permute.xlu0 %594  ;;  %v523_v41 = vmul.f32 %v2164_v46, %v447_v57 }
  0xb2   : > { %v802_v19 = vmax.f32 %v783_v10, 0.0 }
  0xb3   : > { %v641_v54 = vadd.f32 %v622_v40, %v523_v41 }
  0xb4   : > { %v819_v27 = vpack.c.bf16 %v802_v19, %v801_v23 }
  0xb5   : > { %v555_v4 = vpop.permute.xlu1 %554 }
  0xb6   : > { %v661_v7 = vpop.permute.xlu0 %660  ;;  %v621_v56 = vmul.f32 %v2162_v45, %v555_v4 }
  0xb7   : > { %v736_v9 = vmul.f32 %v2166_v48, %v661_v7 }
  0xb9   : > { %v755_v13 = vadd.f32 %v736_v9, %v637_v8 }
  0xba   : > { %v452_v16 = vpop.permute.xlu1 %451  ;;  %v673_v17 = vpop.permute.xlu0 %672 }
  0xbb   : > { %v781_v18 = vadd.f32 %v2186_v5, %v755_v13  ;;  %v524_v37 = vmul.f32 %v2164_v46, %v452_v16  ;;  %v739_v57 = vmul.f32 %v2166_v48, %v673_v17 }
  0xbd   : > { %v800_v22 = vmax.f32 %v781_v18, 0.0  ;;  %v642_v51 = vadd.f32 %v623_v36, %v524_v37 }
  0xbe   : > { %v457_v24 = vpop.permute.xlu1 %456  ;;  %v685_v25 = vpop.permute.xlu0 %684 }
  0xbf   : > { %v818_v26 = vpack.c.bf16 %v800_v22, %v799_v21  ;;  %v525_v43 = vmul.f32 %v2164_v46, %v457_v24  ;;  %v742_v38 = vmul.f32 %v2166_v48, %v685_v25 }
  0xc1   : > { %1823 = vmatprep.mubr.msk.bf16.mxu0 %vm859_vm0, %v818_v26  ;;  %v627_v26 = vmul.f32 %v2162_v45, %v2160_v44 }
  0xc2   : > { %1824 = vmatmul.mubr.msk.bf16.vlgmr.msra.gmra.mrb[0].mxu0 %vm859_vm0, %v819_v27  ;;  %v693_v29 = vpop.permute.xlu0 %692 }
  0xc3   : > { %v567_v30 = vpop.permute.xlu1 %566  ;;  %v744_v18 = vmul.f32 %v2166_v48, %v693_v29 }
  0xc4   : > { %v624_v39 = vmul.f32 %v2162_v45, %v567_v30 }
  0xc6   : > { %v2210_v32 = vpop.permute.xlu0 %704  ;;  %v643_v52 = vadd.f32 %v624_v39, %v525_v43 }
  0xc8   : > { %v677_v33 = vpop.permute.xlu1 %676  ;;  %v761_v61 = vadd.f32 %v742_v38, %v643_v52 }
  0xc9   : > { %v740_v47 = vmul.f32 %v2166_v48, %v677_v33 }
  0xca   : > { %v2222_v42 = vpop.permute.xlu0 %716  ;;  %v787_v3 = vadd.f32 %v2186_v5, %v761_v61 }
  0xcb   : > { %v759_v58 = vadd.f32 %v740_v47, %v641_v54 }
  0xcc   : > { %v681_v50 = vpop.permute.xlu1 %680  ;;  %v806_v10 = vmax.f32 %v787_v3, 0.0 }
  0xcd   : > { %v741_v53 = vmul.f32 %v2166_v48, %v681_v50  ;;  %v785_v1 = vadd.f32 %v2186_v5, %v759_v58 }
  0xcf   : > { %v760_v55 = vadd.f32 %v741_v53, %v642_v51  ;;  %v442_v35 = vpop.permute.xlu0 %441  ;;  %v804_v4 = vmax.f32 %v785_v1, 0.0 }
  0xd0   : > { %v522_v60 = vmul.f32 %v2164_v46, %v442_v35 }
  0xd1   : > { %v462_v62 = vpop.permute.xlu1 %461  ;;  %v786_v0 = vadd.f32 %v2186_v5, %v760_v55 }
  0xd2   : > { %v640_v63 = vadd.f32 %v621_v56, %v522_v60  ;;  %v526_v23 = vmul.f32 %v2164_v46, %v462_v62 }
  0xd3   : > { %v805_v8 = vmax.f32 %v786_v0, 0.0  ;;  %v467_v14 = vpop.permute.xlu0 %466 }
  0xd4   : > { %v758_v2 = vadd.f32 %v739_v57, %v640_v63  ;;  %v527_v17 = vmul.f32 %v2164_v46, %v467_v14 }
  0xd5   : > { %v821_v13 = vpack.c.bf16 %v806_v10, %v805_v8 }
  0xd6   : > { %v784_v6 = vadd.f32 %v2186_v5, %v758_v2  ;;  %v571_v7 = vpop.permute.xlu1 %570 }
  0xd7   : > { %v625_v21 = vmul.f32 %v2162_v45, %v571_v7  ;;  %v472_v22 = vpop.permute.xlu0 %471 }
  0xd8   : > { %v803_v9 = vmax.f32 %v784_v6, 0.0  ;;  %v528_v28 = vmul.f32 %v2164_v46, %v472_v22  ;;  %v747_v6 = vmul.f32 %v2166_v48, %v2210_v32  ;;  %v631_v32 = vmul.f32 %v2162_v45, %v2178_v59 }
  0xd9   : > { %v644_v27 = vadd.f32 %v625_v21, %v526_v23 }
  0xda   : > { %v575_v11 = vpop.permute.xlu1 %574  ;;  %v820_v12 = vpack.c.bf16 %v804_v4, %v803_v9  ;;  %v646_v34 = vadd.f32 %v627_v26, %v528_v28  ;;  %v630_v4 = vmul.f32 %v2162_v45, %v2168_v49 }
  0xdb   : > { %v626_v16 = vmul.f32 %v2162_v45, %v575_v11  ;;  %v482_v61 = vpop.permute.xlu0 %481 }
  0xdc   : > { %1827 = vmatprep.mubr.msk.bf16.mxu0 %vm859_vm0, %v820_v12  ;;  %v530_v0 = vmul.f32 %v2164_v46, %v482_v61  ;;  %v750_v12 = vmul.f32 %v2166_v48, %v2222_v42 }
  0xdd   : > { %1828 = vmatmul.mubr.msk.bf16.gmra.mrb[4].mxu0 %vm859_vm0, %v821_v13  ;;  %v645_v19 = vadd.f32 %v626_v16, %v527_v17 }
  0xdf   : > { %v477_v15 = vpop.permute.xlu1 %476  ;;  %v763_v24 = vadd.f32 %v744_v18, %v645_v19  ;;  %v507_v26 = vpop.permute.xlu0 %506 }
  0xe0   : > { %v529_v41 = vmul.f32 %v2164_v46, %v477_v15 }
  0xe1   : > { %v789_v31 = vadd.f32 %v2186_v5, %v763_v24 }
  0xe3   : > { %v808_v40 = vmax.f32 %v789_v31, 0.0 }
  0xe4   : > { %v583_v20 = vpop.permute.xlu1 %582 }
  0xe5   : > { %v628_v36 = vmul.f32 %v2162_v45, %v583_v20 }
  0xe7   : > { %v647_v50 = vadd.f32 %v628_v36, %v529_v41  ;;  %v512_v36 = vpop.permute.xlu0 %511 }
  0xe9   : > { %v689_v25 = vpop.permute.xlu1 %688 }
  0xea   : > { %v743_v30 = vmul.f32 %v2166_v48, %v689_v25  ;;  %v1983_v25 = vld [vmem:[%s2464_s5 + $0x30] sm:$0xff]  }
  0xeb   : > { %1855 = vmatprep.subr.bf16.mxu1 %v1983_v25 }
  0xec   : > { %v762_v29 = vadd.f32 %v743_v30, %v644_v27  ;;  %1856 = vmatpush3.bf16.msra.mxu1 %v1983_v25 }
  0xed   : > { %v697_v33 = vpop.permute.xlu1 %696 }
  0xee   : > { %v788_v37 = vadd.f32 %v2186_v5, %v762_v29  ;;  %v745_v39 = vmul.f32 %v2166_v48, %v697_v33  ;;  %v1984_v29 = vld [vmem:[%s2464_s5 + $0x38] sm:$0xff]  }
  0xef   : > { %1857 = vmatprep.subr.bf16.mxu1 %v1984_v29 }
  0xf0   : > { %v807_v44 = vmax.f32 %v788_v37, 0.0  ;;  %v764_v43 = vadd.f32 %v745_v39, %v646_v34  ;;  %1858 = vmatpush3.bf16.msra.mxu1 %v1984_v29 }
  0xf1   : > { %v701_v47 = vpop.permute.xlu1 %700 }
  0xf2   : > { %v822_v51 = vpack.c.bf16 %v808_v40, %v807_v44  ;;  %v746_v38 = vmul.f32 %v2166_v48, %v701_v47  ;;  %v790_v52 = vadd.f32 %v2186_v5, %v764_v43  ;;  %v721_v40 = vpop.permute.xlu0 %720 }
  0xf3   : > { %v751_v43 = vmul.f32 %v2166_v48, %v721_v40 }
  0xf4   : > { %v765_v53 = vadd.f32 %v746_v38, %v647_v50  ;;  %1831 = vmatprep.mubr.msk.bf16.mxu0 %vm859_vm0, %v822_v51  ;;  %v809_v35 = vmax.f32 %v790_v52, 0.0  ;;  %v535_v51 = vmul.f32 %v2164_v46, %v507_v26 }
  0xf6   : > { %v791_v54 = vadd.f32 %v2186_v5, %v765_v53  ;;  %v487_v55 = vpop.permute.xlu1 %486 }
  0xf7   : > { %v531_v7 = vmul.f32 %v2164_v46, %v487_v55 }
  0xf8   : > { %v810_v56 = vmax.f32 %v791_v54, 0.0 }
  0xf9   : > { %v649_v13 = vadd.f32 %v630_v4, %v531_v7  ;;  %v1985_v4 = vld [vmem:[%s2466_s7] sm:$0xff]  }
  0xfa   : > { %v823_v57 = vpack.c.bf16 %v810_v56, %v809_v35  ;;  %v536_v35 = vmul.f32 %v2164_v46, %v512_v36  ;;  %1879 = vmatprep.subr.bf16.mxu0 %v1985_v4 }
  0xfb   : > { %v587_v58 = vpop.permute.xlu1 %586  ;;  %1880 = vmatpush3.bf16.msra.mxu0 %v1985_v4 }
  0xfc   : > { %1832 = vmatmul.mubr.msk.bf16.gmra.mrb[8].mxu0 %vm859_vm0, %v823_v57  ;;  %v629_v63 = vmul.f32 %v2162_v45, %v587_v58 }
  0xfe   : > { %v648_v1 = vadd.f32 %v629_v63, %v530_v0 }
 0x100   : > { %v492_v60 = vpop.permute.xlu1 %491  ;;  %v766_v9 = vadd.f32 %v747_v6, %v648_v1 }
 0x101   : > { %v532_v14 = vmul.f32 %v2164_v46, %v492_v60 }
 0x102   : > { %v792_v16 = vadd.f32 %v2186_v5, %v766_v9 }
 0x103   : > { %v650_v49 = vadd.f32 %v631_v32, %v532_v14 }
 0x104   : > { %v497_v62 = vpop.permute.xlu1 %496  ;;  %v811_v22 = vmax.f32 %v792_v16, 0.0 }
 0x105   : > { %v533_v8 = vmul.f32 %v2164_v46, %v497_v62 }
 0x109   : > { %v599_v2 = vpop.permute.xlu1 %598 }
 0x10a   : > { %v632_v3 = vmul.f32 %v2162_v45, %v599_v2 }
 0x10c   : > { %v651_v10 = vadd.f32 %v632_v3, %v533_v8 }
 0x10e   : > { %v709_v11 = vpop.permute.xlu1 %708  ;;  %v769_v17 = vadd.f32 %v750_v12, %v651_v10 }
 0x10f   : > { %v748_v15 = vmul.f32 %v2166_v48, %v709_v11 }
 0x110   : > { %v795_v42 = vadd.f32 %v2186_v5, %v769_v17 }
 0x111   : > { %v767_v18 = vadd.f32 %v748_v15, %v649_v13 }
 0x112   : > { %v713_v19 = vpop.permute.xlu1 %712  ;;  %v814_v30 = vmax.f32 %v795_v42, 0.0 }
 0x113   : > { %v793_v20 = vadd.f32 %v2186_v5, %v767_v18  ;;  %v749_v21 = vmul.f32 %v2166_v48, %v713_v19 }
 0x115   : > { %v812_v23 = vmax.f32 %v793_v20, 0.0  ;;  %v768_v24 = vadd.f32 %v749_v21, %v650_v49 }
 0x117   : > { %v824_v59 = vpack.c.bf16 %v812_v23, %v811_v22  ;;  %v794_v27 = vadd.f32 %v2186_v5, %v768_v24  ;;  %v502_v28 = vpop.permute.xlu1 %501 }
 0x118   : > { %v534_v41 = vmul.f32 %v2164_v46, %v502_v28  ;;  %v2301_v46 = vld [vmem:[%s2463_s4] ss:$0 sm:$0xff] }
 0x119   : > { %v813_v31 = vmax.f32 %v794_v27, 0.0  ;;  %1835 = vmatprep.mubr.msk.bf16.mxu0 %vm859_vm0, %v824_v59 }
 0x11b   : > { %v825_v33 = vpack.c.bf16 %v814_v30, %v813_v31 }
 0x11c   : > { %v603_v34 = vpop.permute.xlu1 %602 }
 0x11d   : > { %1836 = vmatmul.mubr.msk.bf16.gmra.mrb[12].mxu0 %vm859_vm0, %v825_v33  ;;  %v633_v37 = vmul.f32 %v2162_v45, %v603_v34 }
 0x11f   : > { %v652_v44 = vadd.f32 %v633_v37, %v534_v41 }
 0x120   : > { %v607_v39 = vpop.permute.xlu1 %606 }
 0x121   : > { %v634_v50 = vmul.f32 %v2162_v45, %v607_v39  ;;  %v770_v38 = vadd.f32 %v751_v43, %v652_v44 }
 0x123   : > { %v653_v53 = vadd.f32 %v634_v50, %v535_v51  ;;  %v796_v56 = vadd.f32 %v2186_v5, %v770_v38 }
 0x124   : > { %v611_v47 = vpop.permute.xlu1 %610 }
 0x125   : > { %v635_v54 = vmul.f32 %v2162_v45, %v611_v47  ;;  %v815_v63 = vmax.f32 %v796_v56, 0.0 }
 0x127   : > { %v654_v60 = vadd.f32 %v635_v54, %v536_v35 }
 0x129   : > { %v725_v52 = vpop.permute.xlu1 %724 }
 0x12a   : > { %v752_v55 = vmul.f32 %v2166_v48, %v725_v52 }
 0x12c   : > { %v771_v57 = vadd.f32 %v752_v55, %v653_v53 }
 0x12d   : > { %v729_v58 = vpop.permute.xlu1 %728 }
 0x12e   : > { %v797_v61 = vadd.f32 %v2186_v5, %v771_v57  ;;  %v753_v62 = vmul.f32 %v2166_v48, %v729_v58  ;;  %v1987_v58 = vld [vmem:[%s2466_s7 + $0x10] sm:$0xff]  }
 0x130   : > { %v816_v0 = vmax.f32 %v797_v61, 0.0  ;;  %v772_v1 = vadd.f32 %v753_v62, %v654_v60 }
 0x132   : > { %v826_v2 = vpack.c.bf16 %v816_v0, %v815_v63  ;;  %v798_v3 = vadd.f32 %v2186_v5, %v772_v1  ;;  %v1986_v5 = vld [vmem:[%s2466_s7 + $0x8] sm:$0xff]  }
 0x133   : > { %1881 = vmatprep.subr.bf16.mxu0 %v1986_v5 }
 0x134   : > { %v817_v45 = vmax.f32 %v798_v3, 0.0  ;;  %1839 = vmatprep.mubr.msk.bf16.mxu0 %vm859_vm0, %v826_v2  ;;  %1882 = vmatpush3.bf16.msra.mxu0 %v1986_v5  ;;  %v1988_v2 = vld [vmem:[%s2466_s7 + $0x18] sm:$0xff]  }
 0x135   : > { %1883 = vmatprep.subr.bf16.mxu0 %v1987_v58 }
 0x136   : > { %v827_v6 = vpack.c.bf16 %v817_v45, %v817_v45 }
 0x138   : > { %1840 = vmatmul.mubr.msk.bf16.gmra.mrb[16].mxu0 %vm859_vm0, %v827_v6 }
 0x139   : > { %1884 = vmatpush3.bf16.msra.mxu0 %v1987_v58 }
 0x13a   : > { %1885 = vmatprep.subr.bf16.mxu0 %v1988_v2 }
 0x13d   : > { %1886 = vmatpush3.bf16.msra.mxu0 %v1988_v2  ;;  %v1989_v2 = vld [vmem:[%s2468_s9] sm:$0xff]  }
 0x13e   : > { %1907 = vmatprep.subr.bf16.mxu0 %v1989_v2  ;;  %1931 = vmatprep.subr.bf16.mxu1 %v1989_v2 }
 0x195   : > { %v1825_v7 = vpop.f32.mrb[0].mxu0 }
 0x196   : > { %v933_v48 = vadd.f32 %v1825_v7, %v2301_v46  ;;  %v924_v8 = vpop.f32.mrb[1].mxu0 }
 0x197   : > { %v925_v9 = vadd.f32 %v2301_v46, %v924_v8  ;;  %v1826_v10 = vpop.f32.mrb[2].mxu0 }
 0x198   : > { %v936_v11 = vadd.f32 %v1826_v10, %v2301_v46  ;;  %v927_v12 = vpop.f32.mrb[3].mxu0  ;;  %v1004_v14 = vmax.f32 %v933_v48, 0.0 }
 0x199   : > { %v928_v13 = vadd.f32 %v2301_v46, %v927_v12  ;;  %v1002_v32 = vmax.f32 %v925_v9, 0.0 }
 0x19a   : > { %v1005_v15 = vmax.f32 %v936_v11, 0.0 }
 0x19b   : > { %v1003_v16 = vmax.f32 %v928_v13, 0.0  ;;  %v2337_v13 = vld [vmem:[%s2465_s6] ss:$0 sm:$0xff] }
 0x19c   : > { %v1022_v17 = vpack.c.bf16 %v1005_v15, %v1004_v14 }
 0x19d   : > { %v1021_v18 = vpack.c.bf16 %v1003_v16, %v1002_v32 }
 0x19f   : > { %1859 = vmatprep.mubr.bf16.mxu1 %v1021_v18 }
 0x1a0   : > { %1860 = vmatmul.mubr.bf16.vlgmr.msra.gmra.mrb[0].mxu1 %v1022_v17 }
 0x1a1   : > { %1933 = vmatpush3.bf16.msra.mxu1 %v1989_v2 }
 0x1b0   : > { %v1829_v19 = vpop.f32.mrb[4].mxu0 }
 0x1b1   : > { %v949_v49 = vadd.f32 %v1829_v19, %v2301_v46  ;;  %v940_v20 = vpop.f32.mrb[5].mxu0 }
 0x1b2   : > { %v941_v21 = vadd.f32 %v2301_v46, %v940_v20  ;;  %v1830_v22 = vpop.f32.mrb[6].mxu0 }
 0x1b3   : > { %v952_v42 = vadd.f32 %v1830_v22, %v2301_v46  ;;  %v943_v23 = vpop.f32.mrb[7].mxu0  ;;  %v1008_v25 = vmax.f32 %v949_v49, 0.0 }
 0x1b4   : > { %v944_v24 = vadd.f32 %v2301_v46, %v943_v23  ;;  %v1006_v26 = vmax.f32 %v941_v21, 0.0 }
 0x1b5   : > { %v1009_v59 = vmax.f32 %v952_v42, 0.0 }
 0x1b6   : > { %v1007_v27 = vmax.f32 %v944_v24, 0.0 }
 0x1b7   : > { %v1024_v28 = vpack.c.bf16 %v1009_v59, %v1008_v25 }
 0x1b8   : > { %v1023_v30 = vpack.c.bf16 %v1007_v27, %v1006_v26 }
 0x1ba   : > { %1863 = vmatprep.mubr.bf16.mxu1 %v1023_v30 }
 0x1bb   : > { %1864 = vmatmul.mubr.bf16.gmra.mrb[4].mxu1 %v1024_v28 }
 0x1cf   : > { %v1833_v31 = vpop.f32.mrb[8].mxu0 }
 0x1d0   : > { %v965_v29 = vadd.f32 %v1833_v31, %v2301_v46  ;;  %v956_v33 = vpop.f32.mrb[9].mxu0 }
 0x1d1   : > { %v957_v34 = vadd.f32 %v2301_v46, %v956_v33  ;;  %v1834_v36 = vpop.f32.mrb[10].mxu0 }
 0x1d2   : > { %v968_v37 = vadd.f32 %v1834_v36, %v2301_v46  ;;  %v959_v39 = vpop.f32.mrb[11].mxu0  ;;  %v1012_v41 = vmax.f32 %v965_v29, 0.0 }
 0x1d3   : > { %v960_v40 = vadd.f32 %v2301_v46, %v959_v39  ;;  %v1010_v43 = vmax.f32 %v957_v34, 0.0 }
 0x1d4   : > { %v1013_v44 = vmax.f32 %v968_v37, 0.0 }
 0x1d5   : > { %v1011_v47 = vmax.f32 %v960_v40, 0.0 }
 0x1d6   : > { %v1026_v50 = vpack.c.bf16 %v1013_v44, %v1012_v41 }
 0x1d7   : > { %v1025_v51 = vpack.c.bf16 %v1011_v47, %v1010_v43 }
 0x1d9   : > { %1867 = vmatprep.mubr.bf16.mxu1 %v1025_v51 }
 0x1da   : > { %1868 = vmatmul.mubr.bf16.gmra.mrb[8].mxu1 %v1026_v50 }
 0x1f0   : > { %v1837_v38 = vpop.f32.mrb[12].mxu0 }
 0x1f1   : > { %v981_v52 = vadd.f32 %v1837_v38, %v2301_v46  ;;  %v972_v53 = vpop.f32.mrb[13].mxu0 }
 0x1f2   : > { %v973_v54 = vadd.f32 %v2301_v46, %v972_v53  ;;  %v1838_v55 = vpop.f32.mrb[14].mxu0 }
 0x1f3   : > { %v984_v35 = vadd.f32 %v1838_v55, %v2301_v46  ;;  %v975_v56 = vpop.f32.mrb[15].mxu0  ;;  %v1016_v60 = vmax.f32 %v981_v52, 0.0 }
 0x1f4   : > { %v976_v57 = vadd.f32 %v2301_v46, %v975_v56  ;;  %v1014_v62 = vmax.f32 %v973_v54, 0.0 }
 0x1f5   : > { %v1017_v61 = vmax.f32 %v984_v35, 0.0 }
 0x1f6   : > { %v1015_v63 = vmax.f32 %v976_v57, 0.0 }
 0x1f7   : > { %v1028_v0 = vpack.c.bf16 %v1017_v61, %v1016_v60 }
 0x1f8   : > { %v1027_v1 = vpack.c.bf16 %v1015_v63, %v1014_v62 }
 0x1fa   : > { %1871 = vmatprep.mubr.bf16.mxu1 %v1027_v1 }
 0x1fb   : > { %1872 = vmatmul.mubr.bf16.gmra.mrb[12].mxu1 %v1028_v0 }
 0x20b   : > { %v1841_v3 = vpop.f32.mrb[16].mxu0 }
 0x20c   : > { %v997_v45 = vadd.f32 %v1841_v3, %v2301_v46  ;;  %v988_v6 = vpop.f32.mrb[17].mxu0 }
 0x20d   : > { %v989_v7 = vadd.f32 %v2301_v46, %v988_v6  ;;  %v1842_v48 = vpop.f32.mrb[18].mxu0 }
 0x20e   : > { %v991_v8 = vpop.f32.mrb[19].mxu0  ;;  %v1020_v5 = vmax.f32 %v997_v45, 0.0 }
 0x20f   : > { %v992_v4 = vadd.f32 %v2301_v46, %v991_v8  ;;  %v1018_v9 = vmax.f32 %v989_v7, 0.0 }
 0x210   : > { %v1030_v12 = vpack.c.bf16 %v1020_v5, %v1020_v5 }
 0x211   : > { %v1019_v10 = vmax.f32 %v992_v4, 0.0  ;;  %v1990_v4 = vld [vmem:[%s2468_s9 + $0x8] sm:$0xff]  }
 0x212   : > { %1932 = vmatprep.subr.bf16.mxu1 %v1990_v4 }
 0x213   : > { %v1029_v11 = vpack.c.bf16 %v1019_v10, %v1018_v9  ;;  %1934 = vmatpush3.bf16.msra.mxu1 %v1990_v4 }
 0x215   : > { %1875 = vmatprep.mubr.bf16.mxu1 %v1029_v11 }
 0x216   : > { %1876 = vmatmul.mubr.bf16.gmra.mrb[16].mxu1 %v1030_v12 }
 0x273   : > { %v1861_v14 = vpop.f32.mrb[0].mxu1 }
 0x274   : > { %v1145_v15 = vadd.f32 %v1861_v14, %v2337_v13  ;;  %v1136_v32 = vpop.f32.mrb[1].mxu1 }
 0x275   : > { %v1137_v16 = vadd.f32 %v2337_v13, %v1136_v32  ;;  %v1862_v17 = vpop.f32.mrb[2].mxu1 }
 0x276   : > { %v1148_v46 = vadd.f32 %v1862_v17, %v2337_v13  ;;  %v1139_v18 = vpop.f32.mrb[3].mxu1  ;;  %v1216_v49 = vmax.f32 %v1145_v15, 0.0 }
 0x277   : > { %v1140_v19 = vadd.f32 %v2337_v13, %v1139_v18  ;;  %v1214_v21 = vmax.f32 %v1137_v16, 0.0 }
 0x278   : > { %v1217_v20 = vmax.f32 %v1148_v46, 0.0 }
 0x279   : > { %v1215_v22 = vmax.f32 %v1140_v19, 0.0  ;;  %v2377_v19 = vld [vmem:[%s2467_s8] ss:$0 sm:$0xff] }
 0x27a   : > { %v1234_v42 = vpack.c.bf16 %v1217_v20, %v1216_v49 }
 0x27b   : > { %v1233_v23 = vpack.c.bf16 %v1215_v22, %v1214_v21 }
 0x27d   : > { %1887 = vmatprep.mubr.msk.bf16.mxu0 %vm859_vm0, %v1233_v23 }
 0x27e   : > { %1888 = vmatmul.mubr.msk.bf16.vlgmr.msra.gmra.mrb[20].mxu0 %vm859_vm0, %v1234_v42 }
 0x27f   : > { %1908 = vmatpush3.bf16.msra.mxu0 %v1989_v2 }
 0x280   : > { %1909 = vmatprep.subr.bf16.mxu0 %v1990_v4 }
 0x283   : > { %1910 = vmatpush3.bf16.msra.mxu0 %v1990_v4 }
 0x28e   : > { %v1865_v24 = vpop.f32.mrb[4].mxu1 }
 0x28f   : > { %v1161_v25 = vadd.f32 %v1865_v24, %v2337_v13  ;;  %v1152_v59 = vpop.f32.mrb[5].mxu1 }
 0x290   : > { %v1153_v26 = vadd.f32 %v2337_v13, %v1152_v59  ;;  %v1866_v27 = vpop.f32.mrb[6].mxu1 }
 0x291   : > { %v1164_v28 = vadd.f32 %v1866_v27, %v2337_v13  ;;  %v1155_v30 = vpop.f32.mrb[7].mxu1  ;;  %v1220_v29 = vmax.f32 %v1161_v25, 0.0 }
 0x292   : > { %v1156_v31 = vadd.f32 %v2337_v13, %v1155_v30  ;;  %v1218_v34 = vmax.f32 %v1153_v26, 0.0 }
 0x293   : > { %v1221_v33 = vmax.f32 %v1164_v28, 0.0 }
 0x294   : > { %v1219_v36 = vmax.f32 %v1156_v31, 0.0 }
 0x295   : > { %v1236_v37 = vpack.c.bf16 %v1221_v33, %v1220_v29 }
 0x296   : > { %v1235_v39 = vpack.c.bf16 %v1219_v36, %v1218_v34 }
 0x298   : > { %1891 = vmatprep.mubr.msk.bf16.mxu0 %vm859_vm0, %v1235_v39 }
 0x299   : > { %1892 = vmatmul.mubr.msk.bf16.gmra.mrb[24].mxu0 %vm859_vm0, %v1236_v37 }
 0x2ad   : > { %v1869_v40 = vpop.f32.mrb[8].mxu1 }
 0x2ae   : > { %v1177_v41 = vadd.f32 %v1869_v40, %v2337_v13  ;;  %v1168_v44 = vpop.f32.mrb[9].mxu1 }
 0x2af   : > { %v1169_v43 = vadd.f32 %v2337_v13, %v1168_v44  ;;  %v1870_v47 = vpop.f32.mrb[10].mxu1 }
 0x2b0   : > { %v1180_v50 = vadd.f32 %v1870_v47, %v2337_v13  ;;  %v1171_v51 = vpop.f32.mrb[11].mxu1  ;;  %v1224_v52 = vmax.f32 %v1177_v41, 0.0 }
 0x2b1   : > { %v1172_v38 = vadd.f32 %v2337_v13, %v1171_v51  ;;  %v1222_v54 = vmax.f32 %v1169_v43, 0.0 }
 0x2b2   : > { %v1225_v53 = vmax.f32 %v1180_v50, 0.0 }
 0x2b3   : > { %v1223_v55 = vmax.f32 %v1172_v38, 0.0 }
 0x2b4   : > { %v1238_v35 = vpack.c.bf16 %v1225_v53, %v1224_v52 }
 0x2b5   : > { %v1237_v56 = vpack.c.bf16 %v1223_v55, %v1222_v54 }
 0x2b7   : > { %1895 = vmatprep.mubr.msk.bf16.mxu0 %vm859_vm0, %v1237_v56 }
 0x2b8   : > { %1896 = vmatmul.mubr.msk.bf16.gmra.mrb[28].mxu0 %vm859_vm0, %v1238_v35 }
 0x2ce   : > { %v1873_v57 = vpop.f32.mrb[12].mxu1 }
 0x2cf   : > { %v1193_v58 = vadd.f32 %v1873_v57, %v2337_v13  ;;  %v1184_v60 = vpop.f32.mrb[13].mxu1 }
 0x2d0   : > { %v1185_v61 = vadd.f32 %v2337_v13, %v1184_v60  ;;  %v1874_v62 = vpop.f32.mrb[14].mxu1 }
 0x2d1   : > { %v1196_v63 = vadd.f32 %v1874_v62, %v2337_v13  ;;  %v1187_v0 = vpop.f32.mrb[15].mxu1  ;;  %v1228_v3 = vmax.f32 %v1193_v58, 0.0 }
 0x2d2   : > { %v1188_v1 = vadd.f32 %v2337_v13, %v1187_v0  ;;  %v1226_v6 = vmax.f32 %v1185_v61, 0.0 }
 0x2d3   : > { %v1229_v45 = vmax.f32 %v1196_v63, 0.0 }
 0x2d4   : > { %v1227_v7 = vmax.f32 %v1188_v1, 0.0 }
 0x2d5   : > { %v1240_v48 = vpack.c.bf16 %v1229_v45, %v1228_v3 }
 0x2d6   : > { %v1239_v8 = vpack.c.bf16 %v1227_v7, %v1226_v6 }
 0x2d8   : > { %1899 = vmatprep.mubr.msk.bf16.mxu0 %vm859_vm0, %v1239_v8 }
 0x2d9   : > { %1900 = vmatmul.mubr.msk.bf16.gmra.mrb[32].mxu0 %vm859_vm0, %v1240_v48 }
 0x2e9   : > { %v1877_v5 = vpop.f32.mrb[16].mxu1 }
 0x2ea   : > { %v1209_v9 = vadd.f32 %v1877_v5, %v2337_v13  ;;  %v1200_v10 = vpop.f32.mrb[17].mxu1 }
 0x2eb   : > { %v1201_v11 = vadd.f32 %v2337_v13, %v1200_v10  ;;  %v1878_v12 = vpop.f32.mrb[18].mxu1 }
 0x2ec   : > { %v1203_v14 = vpop.f32.mrb[19].mxu1  ;;  %v1232_v32 = vmax.f32 %v1209_v9, 0.0 }
 0x2ed   : > { %v1204_v15 = vadd.f32 %v2337_v13, %v1203_v14  ;;  %v1230_v16 = vmax.f32 %v1201_v11, 0.0 }
 0x2ee   : > { %v1242_v18 = vpack.c.bf16 %v1232_v32, %v1232_v32 }
 0x2ef   : > { %v1231_v17 = vmax.f32 %v1204_v15, 0.0 }
 0x2f1   : > { %v1241_v46 = vpack.c.bf16 %v1231_v17, %v1230_v16 }
 0x2f3   : > { %1903 = vmatprep.mubr.msk.bf16.mxu0 %vm859_vm0, %v1241_v46 }
 0x2f4   : > { %1904 = vmatmul.mubr.msk.bf16.gmra.mrb[36].mxu0 %vm859_vm0, %v1242_v18 }
 0x351   : > { %v1889_v49 = vpop.f32.mrb[20].mxu0 }
 0x352   : > { %v1355_v20 = vadd.f32 %v1889_v49, %v2377_v19  ;;  %v1346_v21 = vpop.f32.mrb[21].mxu0 }
 0x353   : > { %v1347_v13 = vadd.f32 %v2377_v19, %v1346_v21  ;;  %v1890_v22 = vpop.f32.mrb[22].mxu0 }
 0x354   : > { %v1358_v42 = vadd.f32 %v1890_v22, %v2377_v19  ;;  %v1349_v23 = vpop.f32.mrb[23].mxu0  ;;  %v1426_v25 = vmax.f32 %v1355_v20, 0.0 }
 0x355   : > { %v1350_v24 = vadd.f32 %v2377_v19, %v1349_v23  ;;  %v1424_v26 = vmax.f32 %v1347_v13, 0.0 }
 0x356   : > { %v1427_v59 = vmax.f32 %v1358_v42, 0.0  ;;  %v1742_v42 = vld [vmem:[%s2469_s10] ss:$0 sm:$0xff] }
 0x357   : > { %v1425_v27 = vmax.f32 %v1350_v24, 0.0 }
 0x358   : > { %v1444_v28 = vpack.c.bf16 %v1427_v59, %v1426_v25 }
 0x359   : > { %v1443_v30 = vpack.c.bf16 %v1425_v27, %v1424_v26 }
 0x35b   : > { %1911 = vmatprep.mubr.msk.bf16.mxu0 %vm1476_vm1, %v1443_v30 }
 0x35c   : > { %1912 = vmatmul.mubr.msk.bf16.vlgmr.msra.gmra.mrb[40].mxu0 %vm1476_vm1, %v1444_v28 }
 0x36c   : > { %v1893_v31 = vpop.f32.mrb[24].mxu0 }
 0x36d   : > { %v1371_v29 = vadd.f32 %v1893_v31, %v2377_v19  ;;  %v1362_v33 = vpop.f32.mrb[25].mxu0 }
 0x36e   : > { %v1363_v34 = vadd.f32 %v2377_v19, %v1362_v33  ;;  %v1894_v36 = vpop.f32.mrb[26].mxu0 }
 0x36f   : > { %v1374_v37 = vadd.f32 %v1894_v36, %v2377_v19  ;;  %v1365_v39 = vpop.f32.mrb[27].mxu0  ;;  %v1430_v41 = vmax.f32 %v1371_v29, 0.0 }
 0x370   : > { %v1366_v40 = vadd.f32 %v2377_v19, %v1365_v39  ;;  %v1428_v43 = vmax.f32 %v1363_v34, 0.0 }
 0x371   : > { %v1431_v44 = vmax.f32 %v1374_v37, 0.0 }
 0x372   : > { %v1429_v47 = vmax.f32 %v1366_v40, 0.0 }
 0x373   : > { %v1446_v50 = vpack.c.bf16 %v1431_v44, %v1430_v41 }
 0x374   : > { %v1445_v51 = vpack.c.bf16 %v1429_v47, %v1428_v43 }
 0x376   : > { %1915 = vmatprep.mubr.msk.bf16.mxu1 %vm1476_vm1, %v1445_v51 }
 0x377   : > { %1916 = vmatmul.mubr.msk.bf16.vlgmr.msra.gmra.mrb[20].mxu1 %vm1476_vm1, %v1446_v50 }
 0x38b   : > { %v1897_v38 = vpop.f32.mrb[28].mxu0 }
 0x38c   : > { %v1387_v52 = vadd.f32 %v1897_v38, %v2377_v19  ;;  %v1378_v53 = vpop.f32.mrb[29].mxu0 }
 0x38d   : > { %v1379_v54 = vadd.f32 %v2377_v19, %v1378_v53  ;;  %v1898_v55 = vpop.f32.mrb[30].mxu0 }
 0x38e   : > { %v1390_v35 = vadd.f32 %v1898_v55, %v2377_v19  ;;  %v1381_v56 = vpop.f32.mrb[31].mxu0  ;;  %v1434_v58 = vmax.f32 %v1387_v52, 0.0 }
 0x38f   : > { %v1382_v57 = vadd.f32 %v2377_v19, %v1381_v56  ;;  %v1432_v61 = vmax.f32 %v1379_v54, 0.0 }
 0x390   : > { %v1435_v60 = vmax.f32 %v1390_v35, 0.0 }
 0x391   : > { %v1433_v62 = vmax.f32 %v1382_v57, 0.0 }
 0x392   : > { %v1448_v63 = vpack.c.bf16 %v1435_v60, %v1434_v58 }
 0x393   : > { %v1447_v0 = vpack.c.bf16 %v1433_v62, %v1432_v61 }
 0x395   : > { %1919 = vmatprep.mubr.msk.bf16.mxu1 %vm1476_vm1, %v1447_v0 }
 0x396   : > { %1920 = vmatmul.mubr.msk.bf16.gmra.mrb[24].mxu1 %vm1476_vm1, %v1448_v63 }
 0x3ac   : > { %v1901_v1 = vpop.f32.mrb[32].mxu0 }
 0x3ad   : > { %v1403_v2 = vadd.f32 %v1901_v1, %v2377_v19  ;;  %v1394_v3 = vpop.f32.mrb[33].mxu0 }
 0x3ae   : > { %v1395_v45 = vadd.f32 %v2377_v19, %v1394_v3  ;;  %v1902_v6 = vpop.f32.mrb[34].mxu0 }
 0x3af   : > { %v1406_v7 = vadd.f32 %v1902_v6, %v2377_v19  ;;  %v1397_v48 = vpop.f32.mrb[35].mxu0  ;;  %v1438_v4 = vmax.f32 %v1403_v2, 0.0 }
 0x3b0   : > { %v1398_v8 = vadd.f32 %v2377_v19, %v1397_v48  ;;  %v1436_v9 = vmax.f32 %v1395_v45, 0.0 }
 0x3b1   : > { %v1439_v5 = vmax.f32 %v1406_v7, 0.0 }
 0x3b2   : > { %v1437_v10 = vmax.f32 %v1398_v8, 0.0 }
 0x3b3   : > { %v1450_v11 = vpack.c.bf16 %v1439_v5, %v1438_v4 }
 0x3b4   : > { %v1449_v12 = vpack.c.bf16 %v1437_v10, %v1436_v9 }
 0x3b6   : > { %1923 = vmatprep.mubr.msk.bf16.mxu1 %vm1476_vm1, %v1449_v12 }
 0x3b7   : > { %1924 = vmatmul.mubr.msk.bf16.gmra.mrb[28].mxu1 %vm1476_vm1, %v1450_v11 }
 0x3c7   : > { %v1905_v14 = vpop.f32.mrb[36].mxu0 }
 0x3c8   : > { %v1419_v15 = vadd.f32 %v1905_v14, %v2377_v19  ;;  %v1410_v32 = vpop.f32.mrb[37].mxu0 }
 0x3c9   : > { %v1411_v16 = vadd.f32 %v2377_v19, %v1410_v32  ;;  %v1906_v17 = vpop.f32.mrb[38].mxu0 }
 0x3ca   : > { %v1413_v46 = vpop.f32.mrb[39].mxu0  ;;  %v1442_v49 = vmax.f32 %v1419_v15, 0.0 }
 0x3cb   : > { %v1414_v18 = vadd.f32 %v2377_v19, %v1413_v46  ;;  %v1440_v20 = vmax.f32 %v1411_v16, 0.0 }
 0x3cc   : > { %v1452_v22 = vpack.c.bf16 %v1442_v49, %v1442_v49 }
 0x3cd   : > { %v1441_v21 = vmax.f32 %v1414_v18, 0.0 }
 0x3cf   : > { %v1451_v13 = vpack.c.bf16 %v1441_v21, %v1440_v20 }
 0x3d1   : > { %1927 = vmatprep.mubr.msk.bf16.mxu1 %vm1476_vm1, %v1451_v13 }
 0x3d2   : > { %1928 = vmatmul.mubr.msk.bf16.gmra.mrb[32].mxu1 %vm1476_vm1, %v1452_v22 }
 0x42f   : > { %v1913_v19 = vpop.f32.mrb[40].mxu0 }
 0x430   : > { %v1550_v23 = vadd.f32 %v1913_v19, %v1742_v42  ;;  %v1541_v24 = vpop.f32.mrb[41].mxu0 }
 0x431   : > { %v1542_v25 = vadd.f32 %v1742_v42, %v1541_v24  ;;  %v1914_v59 = vpop.f32.mrb[42].mxu0 }
 0x432   : > { %1622 = vst.msk [vmem:[%s2416_s26 + $0x10] sm:$0xff] %vm1619_vm2, %v1550_v23  ;;  %v1553_v26 = vadd.f32 %v1914_v59, %v1742_v42  ;;  %v1544_v27 = vpop.f32.mrb[43].mxu0 }
 0x433   : > { %1620 = vst.msk [vmem:[%s2416_s26] sm:$0xff] %vm1619_vm2, %v1542_v25  ;;  %v1545_v28 = vadd.f32 %v1742_v42, %v1544_v27 }
 0x434   : > { %1623 = vst.msk [vmem:[%s2416_s26 + $0x18] sm:$0xff] %vm1619_vm2, %v1553_v26 }
 0x435   : > { %1621 = vst.msk [vmem:[%s2416_s26 + $0x8] sm:$0xff] %vm1619_vm2, %v1545_v28 }
 0x44a   : > { %v1917_v30 = vpop.f32.mrb[20].mxu1 }
 0x44b   : > { %v1566_v31 = vadd.f32 %v1917_v30, %v1742_v42  ;;  %v1557_v29 = vpop.f32.mrb[21].mxu1 }
 0x44c   : > { %v1558_v33 = vadd.f32 %v1742_v42, %v1557_v29  ;;  %v1918_v34 = vpop.f32.mrb[22].mxu1 }
 0x44d   : > { %1626 = vst.msk [vmem:[%s2416_s26 + $0x30] sm:$0xff] %vm1619_vm2, %v1566_v31  ;;  %v1569_v36 = vadd.f32 %v1918_v34, %v1742_v42  ;;  %v1560_v37 = vpop.f32.mrb[23].mxu1 }
 0x44e   : > { %1624 = vst.msk [vmem:[%s2416_s26 + $0x20] sm:$0xff] %vm1619_vm2, %v1558_v33  ;;  %v1561_v39 = vadd.f32 %v1742_v42, %v1560_v37 }
 0x44f   : > { %1627 = vst.msk [vmem:[%s2416_s26 + $0x38] sm:$0xff] %vm1619_vm2, %v1569_v36 }
 0x450   : > { %1625 = vst.msk [vmem:[%s2416_s26 + $0x28] sm:$0xff] %vm1619_vm2, %v1561_v39 }
 0x469   : > { %v1921_v40 = vpop.f32.mrb[24].mxu1 }
 0x46a   : > { %v1582_v41 = vadd.f32 %v1921_v40, %v1742_v42  ;;  %v1573_v44 = vpop.f32.mrb[25].mxu1 }
 0x46b   : > { %v1574_v43 = vadd.f32 %v1742_v42, %v1573_v44  ;;  %v1922_v47 = vpop.f32.mrb[26].mxu1 }
 0x46c   : > { %1630 = vst.msk [vmem:[%s2416_s26 + $0x50] sm:$0xff] %vm1619_vm2, %v1582_v41  ;;  %v1585_v50 = vadd.f32 %v1922_v47, %v1742_v42  ;;  %v1576_v51 = vpop.f32.mrb[27].mxu1 }
 0x46d   : > { %1628 = vst.msk [vmem:[%s2416_s26 + $0x40] sm:$0xff] %vm1619_vm2, %v1574_v43  ;;  %v1577_v38 = vadd.f32 %v1742_v42, %v1576_v51 }
 0x46e   : > { %1631 = vst.msk [vmem:[%s2416_s26 + $0x58] sm:$0xff] %vm1619_vm2, %v1585_v50 }
 0x46f   : > { %1629 = vst.msk [vmem:[%s2416_s26 + $0x48] sm:$0xff] %vm1619_vm2, %v1577_v38 }
 0x48a   : > { %v1925_v52 = vpop.f32.mrb[28].mxu1 }
 0x48b   : > { %v1598_v53 = vadd.f32 %v1925_v52, %v1742_v42  ;;  %v1589_v54 = vpop.f32.mrb[29].mxu1 }
 0x48c   : > { %v1590_v55 = vadd.f32 %v1742_v42, %v1589_v54  ;;  %v1926_v35 = vpop.f32.mrb[30].mxu1 }
 0x48d   : > { %1634 = vst.msk [vmem:[%s2416_s26 + $0x70] sm:$0xff] %vm1619_vm2, %v1598_v53  ;;  %v1601_v56 = vadd.f32 %v1926_v35, %v1742_v42  ;;  %v1592_v57 = vpop.f32.mrb[31].mxu1 }
 0x48e   : > { %1632 = vst.msk [vmem:[%s2416_s26 + $0x60] sm:$0xff] %vm1619_vm2, %v1590_v55  ;;  %v1593_v58 = vadd.f32 %v1742_v42, %v1592_v57 }
 0x48f   : > { %1635 = vst.msk [vmem:[%s2416_s26 + $0x78] sm:$0xff] %vm1619_vm2, %v1601_v56 }
 0x490   : > { %1633 = vst.msk [vmem:[%s2416_s26 + $0x68] sm:$0xff] %vm1619_vm2, %v1593_v58 }
 0x4a5   : > { %v1929_v60 = vpop.f32.mrb[32].mxu1 }
 0x4a6   : > { %v1614_v61 = vadd.f32 %v1929_v60, %v1742_v42  ;;  %v1605_v62 = vpop.f32.mrb[33].mxu1 }
 0x4a7   : > { %v1606_v63 = vadd.f32 %v1742_v42, %v1605_v62  ;;  %v1930_v0 = vpop.f32.mrb[34].mxu1 }
 0x4a8   : > { %1638 = vst.msk [vmem:[%s2416_s26 + $0x90] sm:$0xff] %vm1619_vm2, %v1614_v61  ;;  %v1608_v1 = vpop.f32.mrb[35].mxu1 }
 0x4a9   : > { %1636 = vst.msk [vmem:[%s2416_s26 + $0x80] sm:$0xff] %vm1619_vm2, %v1606_v63  ;;  %v1609_v2 = vadd.f32 %v1742_v42, %v1608_v1 }
 0x4ab   : > { %1637 = vst.msk [vmem:[%s2416_s26 + $0x88] sm:$0xff] %vm1619_vm2, %v1609_v2 }
 0x4ac PF: > { %s21_s17 = sadd.s32 1, %s1997_s17  }
 0x4ad   : > { %p18_p4 = scmp.ge.s32.totalorder %s21_s17, 4  }
 0x4af   :  { %20 = sbr.rel (!%p18_p4) target bundleno = 1 (0x1), region = 94 }

</bundles_post_ra>
